<compile_context>
chip_gen: v7x
topology: tpu7x:2x2x1
jax: 0.10.0
libtpu: 0.0.40
codegen_flags: <defaults>
</compile_context>

<pallas_src>
import functools

import jax
import jax.numpy as jnp
from jax.experimental import pallas as pl
from jax.experimental.pallas import tpu as pltpu
from jax.scipy.linalg import block_diag


def _round_up(n, m):
    return -(-n // m) * m


def _mlp_head_kernel(x_ref, w1_ref, b1_ref, w2_ref, b2_ref, o_ref, *, compute_dtype):
    """One node tile: out = relu(x @ W1 + b1) @ W2 + b2 (f32 MXU accumulation)."""
    x = x_ref[...].astype(compute_dtype)           # in-kernel downcast: no extra HBM pass
    h = jnp.dot(x, w1_ref[...], preferred_element_type=jnp.float32)   # MXU, f32 acc
    h = jnp.maximum(h + b1_ref[...], 0.0)          # f32 bias + ReLU on VPU (v5e-safe)
    h = h.astype(compute_dtype)
    out = jnp.dot(h, w2_ref[...], preferred_element_type=jnp.float32) + b2_ref[...]
    o_ref[...] = out.astype(o_ref.dtype)


def inductive_node_head(x, y, params, *, tile_m=4096, compute_dtype=jnp.bfloat16):
    """Post-MP MLP head on node features x; labels y pass through.

    x: [N, D] node features (any float dtype; cast per-tile inside the kernel).
    y: labels, returned unchanged.
    params: w1 [D, D], b1 [D], w2 [D, O], b2 [O].
    Returns (pred [N, O] float32, y). Use compute_dtype=jnp.float32 for parity
    with the PyTorch f32 module.
    """
    N, D = x.shape
    O = params["w2"].shape[1]

    # ---- Lane-pack P nodes per row so the feature dim fills the 128-lane vreg.
    P = 128 // D if (D < 128 and 128 % D == 0) else 1
    while P > 1 and N % P:
        P //= 2
    Np, Dp, Op = N // P, P * D, P * O

    x_packed = x.reshape(Np, Dp)                                   # free row-major reshape
    w1 = block_diag(*([params["w1"]] * P)).astype(compute_dtype)   # [Dp, Dp]
    w2 = block_diag(*([params["w2"]] * P)).astype(compute_dtype)   # [Dp, Op]
    b1 = jnp.tile(params["b1"].astype(jnp.float32), P).reshape(1, Dp)
    b2 = jnp.tile(params["b2"].astype(jnp.float32), P).reshape(1, Op)

    # ---- Tile size (in packed rows): large tiles amortize the ~0.35us/step grid
    #      overhead; keep >= 2 steps so "parallel" can feed both v7x TensorCores.
    if Np <= 8:
        tm = Np
    else:
        tm = max(8, min(int(tile_m), _round_up(Np, 8)))
        tm = min(tm, _round_up(pl.cdiv(Np, 2), 8))
    grid = (pl.cdiv(Np, tm),)

    # ---- Explicit VMEM budget: double-buffered x/out/weights + hidden scratch.
    itemsize = jnp.dtype(x.dtype).itemsize
    csize = jnp.dtype(compute_dtype).itemsize
    x_blk = tm * Dp * itemsize
    out_blk = tm * Op * 4
    w_blk = (Dp * Dp + Dp * Op) * csize + (Dp + Op) * 4
    hid_blk = tm * Dp * 4
    vmem_limit = int(2 * (x_blk + out_blk + w_blk) + 3 * hid_blk + (4 << 20))
    vmem_limit = int(min(max(vmem_limit, 32 << 20), 48 << 20))     # safe on v5e/v6e/v7x

    cost = pl.CostEstimate(
        flops=2 * N * (D * D + D * O),
        transcendentals=0,
        bytes_accessed=int(N * (D * itemsize + O * 4) + (D * D + D * O + D + O) * 4),
    )

    out_packed = pl.pallas_call(
        functools.partial(_mlp_head_kernel, compute_dtype=compute_dtype),
        out_shape=jax.ShapeDtypeStruct((Np, Op), jnp.float32),
        grid=grid,
        in_specs=[
            pl.BlockSpec((tm, Dp), lambda i: (i, 0)),   # x tile (streams from HBM)
            pl.BlockSpec((Dp, Dp), lambda i: (0, 0)),   # W1 (VMEM-resident)
            pl.BlockSpec((1, Dp), lambda i: (0, 0)),    # b1
            pl.BlockSpec((Dp, Op), lambda i: (0, 0)),   # W2
            pl.BlockSpec((1, Op), lambda i: (0, 0)),    # b2
        ],
        out_specs=pl.BlockSpec((tm, Op), lambda i: (i, 0)),
        compiler_params=pltpu.CompilerParams(
            dimension_semantics=("parallel",),          # megacore sharding on v7x
            vmem_limit_bytes=vmem_limit,
        ),
        cost_estimate=cost,
    )(x_packed, w1, b1, w2, b2)

    pred = out_packed.reshape(N, O)                     # free row-major reshape back
    return pred, y


if __name__ == "__main__":
    # Small, module-consistent shapes: N nodes, dim_in features, dim_out classes.
    N, dim_in, dim_out = 512, 32, 4

    key = jax.random.PRNGKey(0)
    kx, ky, kp = jax.random.split(key, 3)
    x = jax.random.normal(kx, (N, dim_in), jnp.float32)        # batch.x
    y = jax.random.randint(ky, (N,), 0, dim_out, jnp.int32)    # batch.y

    k1, k2, k3, k4 = jax.random.split(kp, 4)
    params = {
        "w1": jax.random.normal(k1, (dim_in, dim_in), jnp.float32) / jnp.sqrt(dim_in),
        "b1": jax.random.normal(k2, (dim_in,), jnp.float32) * 0.01,
        "w2": jax.random.normal(k3, (dim_in, dim_out), jnp.float32) / jnp.sqrt(dim_in),
        "b2": jax.random.normal(k4, (dim_out,), jnp.float32) * 0.01,
    }

    # Default (bf16 compute) path.
    pred, label = inductive_node_head(x, y, params)
    pred = jax.block_until_ready(pred)
    label = jax.block_until_ready(label)
    assert pred.shape == (N, dim_out) and pred.dtype == jnp.float32
    assert label.shape == (N,) and jnp.array_equal(label, y)

    # bf16 reference (same compute path) — tight tolerance.
    cd = jnp.bfloat16
    h_b = jnp.maximum(
        jnp.dot(x.astype(cd), params["w1"].astype(cd),
                preferred_element_type=jnp.float32) + params["b1"][None, :], 0.0)
    ref_b = (jnp.dot(h_b.astype(cd), params["w2"].astype(cd),
                     preferred_element_type=jnp.float32) + params["b2"][None, :])
    assert jnp.allclose(pred, ref_b, atol=1e-3, rtol=1e-3)

    # Full-f32 reference — loose tolerance for the bf16 path.
    h_f = jnp.maximum(x @ params["w1"] + params["b1"], 0.0)
    ref_f = h_f @ params["w2"] + params["b2"]
    assert jnp.allclose(pred, ref_f, atol=5e-2, rtol=5e-2)

    # Exact-parity switch: f32 compute path.
    pred32, _ = inductive_node_head(x, y, params, compute_dtype=jnp.float32)
    pred32 = jax.block_until_ready(pred32)
    assert jnp.allclose(pred32, ref_f, atol=5e-2, rtol=5e-2)

    # Exercise the masked partial trailing block (row count not a tile multiple).
    N2 = 200
    x2 = jax.random.normal(jax.random.PRNGKey(1), (N2, dim_in), jnp.float32)
    y2 = jnp.zeros((N2,), jnp.int32)
    pred2, _ = inductive_node_head(x2, y2, params)
    pred2 = jax.block_until_ready(pred2)
    h2 = jnp.maximum(x2 @ params["w1"] + params["b1"], 0.0)
    ref2 = h2 @ params["w2"] + params["b2"]
    assert pred2.shape == (N2, dim_out)
    assert jnp.allclose(pred2, ref2, atol=5e-2, rtol=5e-2)

    print("KERNEL_OK")
</pallas_src>

<mosaic_0001>
module attributes {stable_mosaic.version = 11 : i64} {
  func.func @_mlp_head_kernel(%arg0: i32, %arg1: memref<64x128xf32, #tpu.memory_space<vmem>>, %arg2: memref<128x128xbf16, #tpu.memory_space<vmem>>, %arg3: memref<1x128xf32, #tpu.memory_space<vmem>>, %arg4: memref<128x16xbf16, #tpu.memory_space<vmem>>, %arg5: memref<1x16xf32, #tpu.memory_space<vmem>>, %arg6: memref<64x16xf32, #tpu.memory_space<vmem>>) attributes {dimension_semantics = [#tpu.dimension_semantics<parallel>], iteration_bounds = array<i64: 2>, scalar_prefetch = 0 : i64, scratch_operands = 0 : i64, tpu.core_type = #tpu.core_type<tc>, window_params = [{transform_indices = @transform_0, window_bounds = array<i64: 64, 128>}, {pipeline_mode = #tpu.pipeline_mode<synchronous>, transform_indices = @transform_1, window_bounds = array<i64: 128, 128>}, {pipeline_mode = #tpu.pipeline_mode<synchronous>, transform_indices = @transform_2, window_bounds = array<i64: 1, 128>}, {pipeline_mode = #tpu.pipeline_mode<synchronous>, transform_indices = @transform_3, window_bounds = array<i64: 128, 16>}, {pipeline_mode = #tpu.pipeline_mode<synchronous>, transform_indices = @transform_4, window_bounds = array<i64: 1, 16>}, {transform_indices = @transform_5, window_bounds = array<i64: 64, 16>}]} {
    %c0 = arith.constant 0 : index
    %c0_0 = arith.constant 0 : index
    %0 = vector.load %arg1[%c0, %c0_0] : memref<64x128xf32, #tpu.memory_space<vmem>>, vector<64x128xf32>
    %1 = arith.truncf %0 : vector<64x128xf32> to vector<64x128xbf16>
    %c0_1 = arith.constant 0 : index
    %c0_2 = arith.constant 0 : index
    %2 = vector.load %arg2[%c0_1, %c0_2] : memref<128x128xbf16, #tpu.memory_space<vmem>>, vector<128x128xbf16>
    %cst = arith.constant dense<0.000000e+00> : vector<64x128xf32>
    %3 = tpu.matmul %1, %2, %cst {dimension_numbers = #tpu.dot_dimension_numbers<[1], [0], [0], [1], [0, 0, 1, 1], [], []>} : vector<64x128xbf16>, vector<128x128xbf16>, vector<64x128xf32> -> vector<64x128xf32>
    %c0_3 = arith.constant 0 : index
    %c0_4 = arith.constant 0 : index
    %4 = vector.load %arg3[%c0_3, %c0_4] : memref<1x128xf32, #tpu.memory_space<vmem>>, vector<1x128xf32>
    %5 = vector.broadcast %4 : vector<1x128xf32> to vector<64x128xf32>
    %6 = arith.addf %3, %5 : vector<64x128xf32>
    %cst_5 = arith.constant 0.000000e+00 : f32
    %7 = vector.broadcast %cst_5 : f32 to vector<64x128xf32>
    %8 = arith.maximumf %6, %7 : vector<64x128xf32>
    %9 = arith.truncf %8 : vector<64x128xf32> to vector<64x128xbf16>
    %c0_6 = arith.constant 0 : index
    %c0_7 = arith.constant 0 : index
    %10 = vector.load %arg4[%c0_6, %c0_7] : memref<128x16xbf16, #tpu.memory_space<vmem>>, vector<128x16xbf16>
    %cst_8 = arith.constant dense<0.000000e+00> : vector<64x16xf32>
    %11 = tpu.matmul %9, %10, %cst_8 {dimension_numbers = #tpu.dot_dimension_numbers<[1], [0], [0], [1], [0, 0, 1, 1], [], []>} : vector<64x128xbf16>, vector<128x16xbf16>, vector<64x16xf32> -> vector<64x16xf32>
    %c0_9 = arith.constant 0 : index
    %c0_10 = arith.constant 0 : index
    %12 = vector.load %arg5[%c0_9, %c0_10] : memref<1x16xf32, #tpu.memory_space<vmem>>, vector<1x16xf32>
    %13 = vector.broadcast %12 : vector<1x16xf32> to vector<64x16xf32>
    %14 = arith.addf %11, %13 : vector<64x16xf32>
    %c0_11 = arith.constant 0 : index
    %c0_12 = arith.constant 0 : index
    %15 = vector.load %arg6[%c0_11, %c0_12] : memref<64x16xf32, #tpu.memory_space<vmem>>, vector<64x16xf32>
    tpu.vector_store %arg6[%c0_11, %c0_12], %14 {strides = array<i32>} : memref<64x16xf32, #tpu.memory_space<vmem>>, vector<64x16xf32>,
    return
  }
  func.func @transform_0(%arg0: i32) -> (i32, i32) {
    %c0_i32 = arith.constant 0 : i32
    %c0_i32_0 = arith.constant 0 : i32
    return %arg0, %c0_i32 : i32, i32
  }
  func.func @transform_1(%arg0: i32) -> (i32, i32) {
    %c0_i32 = arith.constant 0 : i32
    %c0_i32_0 = arith.constant 0 : i32
    %c0_i32_1 = arith.constant 0 : i32
    return %c0_i32, %c0_i32_0 : i32, i32
  }
  func.func @transform_2(%arg0: i32) -> (i32, i32) {
    %c0_i32 = arith.constant 0 : i32
    %c0_i32_0 = arith.constant 0 : i32
    %c0_i32_1 = arith.constant 0 : i32
    return %c0_i32, %c0_i32_0 : i32, i32
  }
  func.func @transform_3(%arg0: i32) -> (i32, i32) {
    %c0_i32 = arith.constant 0 : i32
    %c0_i32_0 = arith.constant 0 : i32
    %c0_i32_1 = arith.constant 0 : i32
    return %c0_i32, %c0_i32_0 : i32, i32
  }
  func.func @transform_4(%arg0: i32) -> (i32, i32) {
    %c0_i32 = arith.constant 0 : i32
    %c0_i32_0 = arith.constant 0 : i32
    %c0_i32_1 = arith.constant 0 : i32
    return %c0_i32, %c0_i32_0 : i32, i32
  }
  func.func @transform_5(%arg0: i32) -> (i32, i32) {
    %c0_i32 = arith.constant 0 : i32
    %c0_i32_0 = arith.constant 0 : i32
    return %arg0, %c0_i32 : i32, i32
  }
}

</mosaic_0001>

<bundles_post_ra>
// kernel: tpu_custom_call.1
= control target key start
LH: loop header
LB: loop body
LE: loop exit
PB: predicated region body
PF: predicated region fallthrough
CT: control target
= control target key end

     0   :  { %10 = vsyncpa [#allocation3], 0  ;;  %s1059_s0 = inlined_call_operand.hbm [shape: f32[128,128], index: 0, kind: input, shape index: {}]   ;;  %s1060_s1 = inlined_call_operand.vmem [shape: bf16[128,128], index: 1, kind: input, shape index: {}]   ;;  %s1061_s2 = inlined_call_operand.vmem [shape: f32[1,128], index: 2, kind: input, shape index: {}]   ;;  %s1062_s3 = inlined_call_operand.vmem [shape: bf16[128,16], index: 3, kind: input, shape index: {}]   ;;  %s1063_s4 = inlined_call_operand.vmem [shape: f32[1,16], index: 4, kind: input, shape index: {}]   ;;  %s1064_s5 = inlined_call_operand.vmem [shape: f32[128,16], index: 5, kind: output, shape index: {}]  }
   0x1   :  { %12 = vsyncpa [#allocation3 + $0x1], 0  ;;  %s880_s18 = smov 0   ;;  %s882_s19 = smov 0  }
   0x2   :  { %s884_s20 = smov 0   ;;  %s886_s21 = smov 0  }
   0x3 LB: > { %s620_s22 = sadd.s32 4294967295, %s845_s21   ;;  %s900_s23 = sadd.s32 1, %s845_s21   ;;  %s845_s21 = sphi %s886_s21, %s1071_s21   ;;  %s841_s20 = sphi %s884_s20, %s1070_s20   ;;  %s837_s19 = sphi %s882_s19, %s1069_s19   ;;  %s833_s18 = sphi %s880_s18, %s1068_s18  }
   0x4   : > { %s22_s24 = ssub.s32 %s845_s21, %s900_s23  ;;  %s25_s25 = sadd.s32 1, %s841_s20 }
   0x5   : > { %p23_p0 = scmp.eq.s32.totalorder %s22_s24, 0  ;;  %p32_p1 = scmp.ne.s32.totalorder %s841_s20, %s837_s19 }
   0x6   : > { %p33_p2 = scmp.eq.s32.totalorder %s845_s21, 0  ;;  %p38_p3 = scmp.ne.s32.totalorder %s837_s19, %s833_s18 }
   0x7   : > { %s910_s26 = scalar_select %p23_p0, %s841_s20, %s25_s25  }
   0x8   : > { %p34_p4 = por %p33_p2, %p32_p1  ;;  %p39_p5 = scmp.eq.s32.totalorder %s620_s22, 0 }
   0x9   : > { %p730_p6 = scmp.lt.s32.totalorder %s845_s21, 2  ;;  %s184_s28 = sand.u32 1, %s841_s20  }
   0xa   : > { %p915_p7 = por %p39_p5, %p38_p3  ;;  %s624_s29 = sshll.u32 %s184_s28, 6 }
   0xb   : > { %s651_s30 = sshll.u32 %s845_s21, 10  ;;  %s188_s9 = scalar_lea.vmem [#allocation2], %s624_s29 }
   0xc   : > { %s924_s8 = scalar_lea.hbm %s1059_s0, %s651_s30  ;;  %s195_s10 = sshll.u32 %s188_s9, 4  ;;  %s926_s10 = int_to_ptr.vmem [resolvable:$true] %s195_s10 }
   0xd   : > { %p928_p8 = pnand %p730_p6, %p34_p4  ;;  %s933_s12 = scalar_lea.sflag [#allocation3], %s184_s28 }
   0xe   : > { %s781_s13 = scalar_lea.hbm %s924_s8, 1024  ;;  %s786_s16 = scalar_lea.hbm %s1059_s0, 2048 }
   0xf   : > { %p782_p10 = scmp.ne.s32.totalorder %s924_s8, %s781_s13  ;;  %p783_p11 = pneg %p928_p8 }
  0x10   : > { %p787_p0 = scmp.lt.u32.totalorder %s924_s8, %s1059_s0  ;;  %p788_p1 = scmp.lt.u32.totalorder %s786_s16, %s781_s13 }
  0x11   : > { %p784_p12 = pnand %p783_p11, %p782_p10  ;;  %p790_p3 = scmp.lt.u32.totalorder %s781_s13, %s924_s8 }
  0x12   : > { %p789_p2 = por %p788_p1, %p787_p0 }
  0x13   : > { %p785_p13 = pneg %p784_p12 }
  0x14   : > { %p791_p4 = por %p790_p3, %p789_p2 }
  0x16   : > { %p792_p5 = pnand %p791_p4, %p785_p13 }
  0x18   : > { %795 = shalt.err (!%p792_p5)
}
  0x19   : > { %s796_s24 = scalar_lea.vmem %s926_s10, 1024  ;;  %s847_s25 = smov [#allocation2]  }
  0x1a   : > { %p797_p6 = scmp.ne.s32.totalorder %s926_s10, %s796_s24  ;;  %s801_s28 = sshll.u32 %s847_s25, 4  ;;  %s802_s28 = int_to_ptr.vmem [resolvable:$false] %s801_s28 }
  0x1b   : > { %s803_s29 = scalar_lea.vmem %s802_s28, 2048  ;;  %p804_p9 = scmp.lt.s32.totalorder %s926_s10, %s802_s28 }
  0x1c   : > { %p799_p10 = pnand %p797_p6, %p783_p11  ;;  %p805_p0 = scmp.lt.s32.totalorder %s803_s29, %s796_s24 }
  0x1e   : > { %p800_p12 = pneg %p799_p10  ;;  %p806_p1 = por %p805_p0, %p804_p9 }
  0x20   : > { %p807_p2 = pnand %p806_p1, %p800_p12 }
  0x22   : > { %810 = shalt.err (!%p807_p2)
}
  0x23   : > { %s848_s30 = smov 128   ;;  %s849_s6 = smov 8  }
  0x24   : > { %729 = dma.hbm_to_vmem [thread:$0]  (!%p928_p8), %s924_s8, 1024, %s926_s10, %s933_s12, %s848_s30, %s848_s30, %s849_s6  }
  0x25   : > { %p203_p11 = scmp.lt.s32.totalorder %s845_s21, 3  ;;  %p1067_p13 = scmp.ge.s32.totalorder %s845_s21, 1 }
  0x27   : > { %p204_p3 = pnand %p1067_p13, %p203_p11 }
  0x28   : > { %s209_s7 = sand.u32 (!%p204_p3), 1, %s837_s19  }
  0x29   : > { %207 = sbr.rel (%p204_p3) target bundleno = 530 (0x212), region = 40  ;;  %s628_s9 = sshll.u32 (!%p204_p3), %s209_s7, 6 }
  0x2a   : > { %s210_s13 = scalar_lea.sflag (!%p204_p3), [#allocation3], %s209_s7  ;;  %s965_s14 = scalar_lea.vmem (!%p204_p3), [#allocation2], %s628_s9 }
  0x30   : > { %828 = dma.done.wait (%p915_p7), %s210_s13, 1024  }
  0x31   : > { %830 = vsyncadd (%p915_p7), %s210_s13, 4294966272  ;;  %v765_v0 = vld [vmem:[%s1060_s1] sm:$0xff]   ;;  %v766_v1 = vld [vmem:[%s1060_s1 + $0x8] sm:$0xff]   ;;  %vm544_vm0 = vcmask 130048  }
  0x32   : > { %676 = vmatprep.subr.bf16.mxu0 %v765_v0  ;;  %v767_v2 = vld [vmem:[%s1060_s1 + $0x10] sm:$0xff]   ;;  %v768_v3 = vld [vmem:[%s1060_s1 + $0x18] sm:$0xff]   ;;  %v248_v4 = vld [vmem:[%s965_s14] sm:$0xff] }
  0x33   : > { %677 = vmatpush3.bf16.msra.mxu0 %v765_v0  ;;  %v249_v5 = vld [vmem:[%s965_s14 + $0x8] sm:$0xff]  ;;  %v769_v7 = vld [vmem:[%s1060_s1 + $0x20] sm:$0xff]   ;;  %v775_v10 = vld [vmem:[%s1062_s3 + $0x10] sm:$0xff]  }
  0x34   : > { %678 = vmatprep.subr.bf16.mxu0 %v766_v1  ;;  %v256_v6 = vpack.c.bf16 %v249_v5, %v248_v4  ;;  %v773_v8 = vld [vmem:[%s1062_s3] sm:$0xff]   ;;  %v774_v9 = vld [vmem:[%s1062_s3 + $0x8] sm:$0xff]   ;;  %v776_v12 = vld [vmem:[%s1062_s3 + $0x18] sm:$0xff]  }
  0x35   : > { %700 = vmatprep.subr.bf16.mxu1 %v773_v8  ;;  %v770_v11 = vld [vmem:[%s1060_s1 + $0x28] sm:$0xff]   ;;  %v771_v13 = vld [vmem:[%s1060_s1 + $0x30] sm:$0xff]   ;;  %v777_v14 = vld [vmem:[%s1062_s3 + $0x20] sm:$0xff]  }
  0x36   : > { %692 = vmatprep.mubr.bf16.mxu0 %v256_v6  ;;  %701 = vmatpush3.bf16.msra.mxu1 %v773_v8  ;;  %v772_v15 = vld [vmem:[%s1060_s1 + $0x38] sm:$0xff]   ;;  %v250_v16 = vld [vmem:[%s965_s14 + $0x10] sm:$0xff]  ;;  %v778_v18 = vld [vmem:[%s1062_s3 + $0x28] sm:$0xff]  }
  0x37   : > { %679 = vmatpush3.bf16.msra.mxu0 %v766_v1  ;;  %702 = vmatprep.subr.bf16.mxu1 %v774_v9  ;;  %v251_v17 = vld [vmem:[%s965_s14 + $0x18] sm:$0xff]  ;;  %v252_v19 = vld [vmem:[%s965_s14 + $0x20] sm:$0xff]  ;;  %v253_v20 = vld [vmem:[%s965_s14 + $0x28] sm:$0xff] }
  0x38   : > { %680 = vmatprep.subr.bf16.mxu0 %v767_v2  ;;  %v257_v21 = vpack.c.bf16 %v251_v17, %v250_v16  ;;  %v258_v22 = vpack.c.bf16 %v253_v20, %v252_v19  ;;  %v254_v23 = vld [vmem:[%s965_s14 + $0x30] sm:$0xff]  ;;  %v255_v24 = vld [vmem:[%s965_s14 + $0x38] sm:$0xff]  ;;  %v631_v28 = vld [vmem:[%s1061_s2] ss:$0 sm:$0xff]  ;;  %s629_s14 = sshll.u32 %s620_s22, 3 }
  0x39   : > { %v259_v25 = vpack.c.bf16 %v255_v24, %v254_v23  ;;  %v779_v26 = vld [vmem:[%s1062_s3 + $0x30] sm:$0xff]   ;;  %v780_v27 = vld [vmem:[%s1062_s3 + $0x38] sm:$0xff]   ;;  %p242_p7 = scmp.lt.s32.totalorder %s629_s14, 15  ;;  %v640_v57 = vld [vmem:[%s1063_s4] ss:$0 sm:$0xff] }
  0x3a   : > { %703 = vmatpush3.bf16.msra.mxu1 %v774_v9 }
  0x3b   : > { %681 = vmatpush3.bf16.msra.mxu0 %v767_v2  ;;  %704 = vmatprep.subr.bf16.mxu1 %v775_v10  ;;  %s1073_s14 = smov (!%p242_p7, %s629_s14), 15 }
  0x3c   : > { %682 = vmatprep.subr.bf16.mxu0 %v768_v3  ;;  %s630_s9 = sshll.u32 %s1073_s14, 3 }
  0x3d   : > { %s245_s10 = scalar_lea.vmem %s1064_s5, %s630_s9 }
  0x3e   : > { %705 = vmatpush3.bf16.msra.mxu1 %v775_v10 }
  0x3f   : > { %683 = vmatpush3.bf16.msra.mxu0 %v768_v3  ;;  %706 = vmatprep.subr.bf16.mxu1 %v776_v12 }
  0x40   : > { %684 = vmatprep.subr.bf16.mxu0 %v769_v7 }
  0x42   : > { %707 = vmatpush3.bf16.msra.mxu1 %v776_v12 }
  0x43   : > { %685 = vmatpush3.bf16.msra.mxu0 %v769_v7  ;;  %708 = vmatprep.subr.bf16.mxu1 %v777_v14 }
  0x44   : > { %686 = vmatprep.subr.bf16.mxu0 %v770_v11 }
  0x46   : > { %709 = vmatpush3.bf16.msra.mxu1 %v777_v14 }
  0x47   : > { %687 = vmatpush3.bf16.msra.mxu0 %v770_v11  ;;  %710 = vmatprep.subr.bf16.mxu1 %v778_v18 }
  0x48   : > { %688 = vmatprep.subr.bf16.mxu0 %v771_v13 }
  0x4a   : > { %711 = vmatpush3.bf16.msra.mxu1 %v778_v18 }
  0x4b   : > { %689 = vmatpush3.bf16.msra.mxu0 %v771_v13  ;;  %712 = vmatprep.subr.bf16.mxu1 %v779_v26 }
  0x4c   : > { %690 = vmatprep.subr.bf16.mxu0 %v772_v15 }
  0x4e   : > { %713 = vmatpush3.bf16.msra.mxu1 %v779_v26 }
  0x4f   : > { %691 = vmatpush3.bf16.msra.mxu0 %v772_v15  ;;  %714 = vmatprep.subr.bf16.mxu1 %v780_v27 }
  0x52   : > { %693 = vmatmul.mubr.bf16.vlgmr.msra.gmra.mrb[0].mxu0 %v257_v21  ;;  %715 = vmatpush3.bf16.msra.mxu1 %v780_v27 }
  0x53   : > { %696 = vmatprep.mubr.bf16.mxu0 %v258_v22 }
  0x5a   : > { %697 = vmatmul.mubr.bf16.gmra.mrb[4].mxu0 %v259_v25 }
 0x125   : > { %v694_v29 = vpop.f32.mrb[0].mxu0 }
 0x126   : > { %v374_v30 = vadd.f32 %v694_v29, %v631_v28  ;;  %v365_v31 = vpop.f32.mrb[1].mxu0 }
 0x127   : > { %v366_v32 = vadd.f32 %v631_v28, %v365_v31  ;;  %v695_v33 = vpop.f32.mrb[2].mxu0 }
 0x128   : > { %v377_v34 = vadd.f32 %v695_v33, %v631_v28  ;;  %v368_v35 = vpop.f32.mrb[3].mxu0  ;;  %v398_v37 = vmax.f32 %v374_v30, 0.0 }
 0x129   : > { %v369_v36 = vadd.f32 %v631_v28, %v368_v35  ;;  %v396_v39 = vmax.f32 %v366_v32, 0.0 }
 0x12a   : > { %v399_v38 = vmax.f32 %v377_v34, 0.0 }
 0x12b   : > { %v397_v40 = vmax.f32 %v369_v36, 0.0 }
 0x12c   : > { %v405_v41 = vpack.c.bf16 %v399_v38, %v398_v37 }
 0x12d   : > { %v698_v42 = vpop.f32.mrb[4].mxu0  ;;  %v404_v43 = vpack.c.bf16 %v397_v40, %v396_v39 }
 0x12e   : > { %v390_v44 = vadd.f32 %v698_v42, %v631_v28  ;;  %v381_v45 = vpop.f32.mrb[5].mxu0 }
 0x12f   : > { %v382_v46 = vadd.f32 %v631_v28, %v381_v45  ;;  %v699_v47 = vpop.f32.mrb[6].mxu0  ;;  %716 = vmatprep.mubr.bf16.mxu1 %v404_v43 }
 0x130   : > { %v393_v48 = vadd.f32 %v699_v47, %v631_v28  ;;  %v384_v49 = vpop.f32.mrb[7].mxu0  ;;  %717 = vmatmul.mubr.bf16.vlgmr.msra.gmra.mrb[0].mxu1 %v405_v41  ;;  %v402_v51 = vmax.f32 %v390_v44, 0.0 }
 0x131   : > { %v385_v50 = vadd.f32 %v631_v28, %v384_v49  ;;  %v400_v53 = vmax.f32 %v382_v46, 0.0 }
 0x132   : > { %v403_v52 = vmax.f32 %v393_v48, 0.0 }
 0x133   : > { %v401_v54 = vmax.f32 %v385_v50, 0.0 }
 0x134   : > { %v407_v55 = vpack.c.bf16 %v403_v52, %v402_v51 }
 0x135   : > { %v406_v56 = vpack.c.bf16 %v401_v54, %v400_v53 }
 0x137   : > { %720 = vmatprep.mubr.bf16.mxu1 %v406_v56 }
 0x138   : > { %721 = vmatmul.mubr.bf16.gmra.mrb[4].mxu1 %v407_v55 }
 0x203   : > { %v718_v58 = vpop.f32.mrb[0].mxu1 }
 0x204   : > { %v522_v59 = vadd.f32 %v718_v58, %v640_v57  ;;  %v513_v60 = vpop.f32.mrb[1].mxu1 }
 0x205   : > { %v514_v61 = vadd.f32 %v640_v57, %v513_v60  ;;  %v719_v62 = vpop.f32.mrb[2].mxu1 }
 0x206   : > { %547 = vst.msk [vmem:[%s245_s10 + $0x10] sm:$0xff] %vm544_vm0, %v522_v59  ;;  %v525_v63 = vadd.f32 %v719_v62, %v640_v57  ;;  %v516_v0 = vpop.f32.mrb[3].mxu1 }
 0x207   : > { %545 = vst.msk [vmem:[%s245_s10] sm:$0xff] %vm544_vm0, %v514_v61  ;;  %v517_v1 = vadd.f32 %v640_v57, %v516_v0 }
 0x208   : > { %548 = vst.msk [vmem:[%s245_s10 + $0x18] sm:$0xff] %vm544_vm0, %v525_v63 }
 0x209   : > { %546 = vst.msk [vmem:[%s245_s10 + $0x8] sm:$0xff] %vm544_vm0, %v517_v1 }
 0x20b   : > { %v722_v2 = vpop.f32.mrb[4].mxu1 }
 0x20c   : > { %v538_v3 = vadd.f32 %v722_v2, %v640_v57  ;;  %v529_v4 = vpop.f32.mrb[5].mxu1 }
 0x20d   : > { %v530_v5 = vadd.f32 %v640_v57, %v529_v4  ;;  %v723_v6 = vpop.f32.mrb[6].mxu1 }
 0x20e   : > { %551 = vst.msk [vmem:[%s245_s10 + $0x30] sm:$0xff] %vm544_vm0, %v538_v3  ;;  %v541_v7 = vadd.f32 %v723_v6, %v640_v57  ;;  %v532_v8 = vpop.f32.mrb[7].mxu1 }
 0x20f   : > { %549 = vst.msk [vmem:[%s245_s10 + $0x20] sm:$0xff] %vm544_vm0, %v530_v5  ;;  %v533_v9 = vadd.f32 %v640_v57, %v532_v8 }
 0x210   : > { %552 = vst.msk [vmem:[%s245_s10 + $0x38] sm:$0xff] %vm544_vm0, %v541_v7 }
 0x211   : > { %550 = vst.msk [vmem:[%s245_s10 + $0x28] sm:$0xff] %vm544_vm0, %v533_v9 }
 0x212 PF: > { %p15_p8 = scmp.ge.s32.totalorder %s900_s23, 4   ;;  %s1068_s18 = smov %s837_s19 }
 0x213   : > { %s1069_s19 = smov %s841_s20  ;;  %s1070_s20 = smov %s910_s26 }
 0x214   : > { %s1071_s21 = smov %s900_s23  ;;  %17 = sbr.rel (!%p15_p8) target bundleno = 3 (0x3), region = 80 }
 0x21b   :  { %575 = vsyncpa [#allocation3], 1 }
 0x21c   :  { %577 = vsyncpa [#allocation3 + $0x1], 1 }

</bundles_post_ra>
